<compile_context>
chip_gen: v7x
topology: tpu7x:2x2x1
jax: 0.10.0
libtpu: 0.0.40
codegen_flags: <defaults>
</compile_context>

<pallas_src>
import functools

import jax
import jax.numpy as jnp
from jax import lax
from jax.experimental import pallas as pl
from jax.experimental.pallas import tpu as pltpu


# ----------------------------- Pallas kernel --------------------------------

def _time_predict_kernel(tok_ref, table_ref, w1_ref, b1_ref, w2_ref, b2_ref, o_ref,
                         *, seq, vocab, dim):
    # tok:   [TB, S]   int32 (VMEM)
    # table: [V, D]    bf16  (VMEM)
    # w1:    [S*D, H]  bf16  (VMEM)
    # b1:    [1, H]    f32   (VMEM, lane-aligned)
    # w2:    [1, H]    f32   (VMEM, row of the C=1 output Linear)
    # b2:    [1, 1]    f32   (SMEM scalar)
    # out:   [TB, 1]   f32
    tb = tok_ref.shape[0]
    hidden = w1_ref.shape[1]

    tok = tok_ref[...]                                            # [TB, S] int32
    table = table_ref[...]                                        # [V, D] bf16
    viota = lax.broadcasted_iota(jnp.int32, (tb, vocab), 1)       # [TB, V]

    # Fused embed-gather + first Linear: for each position s, build a one-hot
    # [TB, V] on the VPU, gather the embedding rows with a tiny MXU matmul, and
    # accumulate its contribution through the matching w1 slice (f32 accumulator).
    acc = jnp.zeros((tb, hidden), jnp.float32)
    for s in range(seq):                                          # static unroll (S small)
        onehot = jnp.where(tok[:, s:s + 1] == viota, 1.0, 0.0).astype(jnp.bfloat16)
        emb_s = jnp.dot(onehot, table, preferred_element_type=jnp.float32)   # [TB, D]
        w1_s = w1_ref[s * dim:(s + 1) * dim, :]                   # [D, H] bf16 (static slice)
        acc = acc + jnp.dot(emb_s.astype(jnp.bfloat16), w1_s,
                            preferred_element_type=jnp.float32)

    h = jnp.maximum(acc + b1_ref[...], 0.0)                       # ReLU on VPU, f32

    # Second Linear (H -> 1): VPU multiply + XLU lane reduction instead of an
    # N=1 MXU matmul; scalar bias read from SMEM.
    o = jnp.sum(h * w2_ref[...], axis=-1, keepdims=True) + b2_ref[0, 0]      # [TB, 1]
    o_ref[...] = o.astype(o_ref.dtype)


def time_predict_pallas(tokens, table, w1, b1, w2, b2, *, block_b=8):
    """Fused embed + Linear + ReLU + Linear(C=1) forward in one pallas_call."""
    B, S = tokens.shape
    V, D = table.shape
    F, H = w1.shape
    assert F == S * D, "w1 first dim must be S*D"
    assert B % block_b == 0, "batch must be a multiple of block_b"

    kernel = functools.partial(_time_predict_kernel, seq=S, vocab=V, dim=D)
    return pl.pallas_call(
        kernel,
        out_shape=jax.ShapeDtypeStruct((B, 1), jnp.float32),
        grid_spec=pltpu.PrefetchScalarGridSpec(
            num_scalar_prefetch=0,
            grid=(B // block_b,),
            in_specs=[
                pl.BlockSpec((block_b, S), lambda i: (i, 0)),        # tokens
                pl.BlockSpec((V, D), lambda i: (0, 0)),              # embed table (bf16)
                pl.BlockSpec((F, H), lambda i: (0, 0)),              # w1 (bf16)
                pl.BlockSpec((1, H), lambda i: (0, 0)),              # b1
                pl.BlockSpec((1, H), lambda i: (0, 0)),              # w2 row
                pl.BlockSpec(memory_space=pltpu.MemorySpace.SMEM),   # b2 scalar
            ],
            out_specs=pl.BlockSpec((block_b, 1), lambda i: (i, 0)),
        ),
        compiler_params=pltpu.CompilerParams(
            # Batch axis shards across both TensorCores on v7x at larger B.
            dimension_semantics=("parallel",),
        ),
    )(tokens, table, w1, b1, w2, b2)


# ----------------------------- Parameter init -------------------------------

def _xavier_uniform(key, shape, dtype=jnp.float32):
    fan_in, fan_out = shape[0], shape[1]
    bound = (6.0 / (fan_in + fan_out)) ** 0.5
    return jax.random.uniform(key, shape, dtype, minval=-bound, maxval=bound)


def init_params(key, vocab=32, seq=8, embed_dim=32, hidden=128, num_classes=1):
    # num_classes fixed to 1 here (C=1 head is implemented as a lane reduction).
    assert num_classes == 1
    k_emb, k_w1, k_w2 = jax.random.split(key, 3)
    return {
        # Embed.Net: embedding table (xavier weight, per init_weight()), bf16 for the MXU.
        "embed_table": _xavier_uniform(k_emb, (vocab, embed_dim)).astype(jnp.bfloat16),
        # FullConnect.Net: Linear(S*D -> H) + ReLU + Linear(H -> 1), xavier W / zero b.
        "w1": _xavier_uniform(k_w1, (seq * embed_dim, hidden)).astype(jnp.bfloat16),
        "b1": jnp.zeros((1, hidden), jnp.float32),
        "w2": _xavier_uniform(k_w2, (hidden, num_classes)).T.astype(jnp.float32),  # [1, H]
        "b2": jnp.zeros((1, 1), jnp.float32),
    }


# ----------------------------- Forward (TimePredict) ------------------------

def time_predict_forward(params, tokens):
    return time_predict_pallas(
        tokens,
        params["embed_table"],
        params["w1"],
        params["b1"],
        params["w2"],
        params["b2"],
    )


# ----------------------------- Main ------------------------------------------

if __name__ == "__main__":
    key = jax.random.PRNGKey(0)
    k_params, k_tokens = jax.random.split(key)

    B, S, V, D, H, C = 8, 8, 32, 32, 128, 1
    params = init_params(k_params, vocab=V, seq=S, embed_dim=D,
                         hidden=H, num_classes=C)
    tokens = jax.random.randint(k_tokens, (B, S), 0, V, dtype=jnp.int32)

    out = time_predict_forward(params, tokens)
    out = jax.block_until_ready(out)

    # Pure-JAX reference of the same forward (f32 math on the bf16-stored weights).
    table_f32 = params["embed_table"].astype(jnp.float32)
    w1_f32 = params["w1"].astype(jnp.float32)
    emb = jnp.take(table_f32, tokens, axis=0).reshape(B, -1)            # [B, S*D]
    h_ref = jnp.maximum(emb @ w1_f32 + params["b1"], 0.0)               # [B, H]
    ref = jnp.sum(h_ref * params["w2"], axis=-1, keepdims=True) + params["b2"]

    assert out.shape == (B, C)
    assert jnp.allclose(out, ref, atol=1e-2, rtol=1e-2), (out, ref)

    print("KERNEL_OK")
</pallas_src>

<mosaic_0001>
module attributes {stable_mosaic.version = 11 : i64} {
  func.func @_time_predict_kernel(%arg0: i32, %arg1: memref<8x8xi32, #tpu.memory_space<vmem>>, %arg2: memref<32x32xbf16, #tpu.memory_space<vmem>>, %arg3: memref<256x128xbf16, #tpu.memory_space<vmem>>, %arg4: memref<1x128xf32, #tpu.memory_space<vmem>>, %arg5: memref<1x128xf32, #tpu.memory_space<vmem>>, %arg6: memref<1x1xf32, #tpu.memory_space<smem>>, %arg7: memref<8x1xf32, #tpu.memory_space<vmem>>) attributes {dimension_semantics = [#tpu.dimension_semantics<parallel>], iteration_bounds = array<i64: 1>, scalar_prefetch = 0 : i64, scratch_operands = 0 : i64, tpu.core_type = #tpu.core_type<tc>, window_params = [{transform_indices = @transform_0, window_bounds = array<i64: 8, 8>}, {pipeline_mode = #tpu.pipeline_mode<synchronous>, transform_indices = @transform_1, window_bounds = array<i64: 32, 32>}, {pipeline_mode = #tpu.pipeline_mode<synchronous>, transform_indices = @transform_2, window_bounds = array<i64: 256, 128>}, {pipeline_mode = #tpu.pipeline_mode<synchronous>, transform_indices = @transform_3, window_bounds = array<i64: 1, 128>}, {pipeline_mode = #tpu.pipeline_mode<synchronous>, transform_indices = @transform_4, window_bounds = array<i64: 1, 128>}, {transform_indices = @transform_5, window_bounds = array<i64: 1, 1>}, {transform_indices = @transform_6, window_bounds = array<i64: 8, 1>}]} {
    %c0 = arith.constant 0 : index
    %c0_0 = arith.constant 0 : index
    %0 = vector.load %arg1[%c0, %c0_0] : memref<8x8xi32, #tpu.memory_space<vmem>>, vector<8x8xi32>
    %c0_1 = arith.constant 0 : index
    %c0_2 = arith.constant 0 : index
    %1 = vector.load %arg2[%c0_1, %c0_2] : memref<32x32xbf16, #tpu.memory_space<vmem>>, vector<32x32xbf16>
    %2 = tpu.iota {dimensions = array<i32: 1>} : vector<8x32xi32>
    %cst = arith.constant 0.000000e+00 : f32
    %3 = vector.broadcast %cst : f32 to vector<8x128xf32>
    %4 = vector.extract_strided_slice %0 {offsets = [0, 0], sizes = [8, 1], strides = [1, 1]} : vector<8x8xi32> to vector<8x1xi32>
    %5 = vector.broadcast %4 : vector<8x1xi32> to vector<8x32xi32>
    %6 = arith.cmpi eq, %5, %2 : vector<8x32xi32>
    %cst_3 = arith.constant 1.000000e+00 : f32
    %cst_4 = arith.constant 0.000000e+00 : f32
    %7 = vector.broadcast %cst_3 : f32 to vector<8x32xf32>
    %8 = vector.broadcast %cst_4 : f32 to vector<8x32xf32>
    %9 = arith.select %6, %7, %8 : vector<8x32xi1>, vector<8x32xf32>
    %10 = arith.truncf %9 : vector<8x32xf32> to vector<8x32xbf16>
    %cst_5 = arith.constant dense<0.000000e+00> : vector<8x32xf32>
    %11 = tpu.matmul %10, %1, %cst_5 {dimension_numbers = #tpu.dot_dimension_numbers<[1], [0], [0], [1], [0, 0, 1, 1], [], []>} : vector<8x32xbf16>, vector<32x32xbf16>, vector<8x32xf32> -> vector<8x32xf32>
    %c0_6 = arith.constant 0 : index
    %c0_7 = arith.constant 0 : index
    %12 = vector.load %arg3[%c0_6, %c0_7] : memref<256x128xbf16, #tpu.memory_space<vmem>>, vector<32x128xbf16>
    %13 = arith.truncf %11 : vector<8x32xf32> to vector<8x32xbf16>
    %cst_8 = arith.constant dense<0.000000e+00> : vector<8x128xf32>
    %14 = tpu.matmul %13, %12, %cst_8 {dimension_numbers = #tpu.dot_dimension_numbers<[1], [0], [0], [1], [0, 0, 1, 1], [], []>} : vector<8x32xbf16>, vector<32x128xbf16>, vector<8x128xf32> -> vector<8x128xf32>
    %15 = arith.addf %3, %14 : vector<8x128xf32>
    %16 = vector.extract_strided_slice %0 {offsets = [0, 1], sizes = [8, 1], strides = [1, 1]} : vector<8x8xi32> to vector<8x1xi32>
    %17 = vector.broadcast %16 : vector<8x1xi32> to vector<8x32xi32>
    %18 = arith.cmpi eq, %17, %2 : vector<8x32xi32>
    %cst_9 = arith.constant 1.000000e+00 : f32
    %cst_10 = arith.constant 0.000000e+00 : f32
    %19 = vector.broadcast %cst_9 : f32 to vector<8x32xf32>
    %20 = vector.broadcast %cst_10 : f32 to vector<8x32xf32>
    %21 = arith.select %18, %19, %20 : vector<8x32xi1>, vector<8x32xf32>
    %22 = arith.truncf %21 : vector<8x32xf32> to vector<8x32xbf16>
    %cst_11 = arith.constant dense<0.000000e+00> : vector<8x32xf32>
    %23 = tpu.matmul %22, %1, %cst_11 {dimension_numbers = #tpu.dot_dimension_numbers<[1], [0], [0], [1], [0, 0, 1, 1], [], []>} : vector<8x32xbf16>, vector<32x32xbf16>, vector<8x32xf32> -> vector<8x32xf32>
    %c32 = arith.constant 32 : index
    %c0_12 = arith.constant 0 : index
    %24 = vector.load %arg3[%c32, %c0_12] : memref<256x128xbf16, #tpu.memory_space<vmem>>, vector<32x128xbf16>
    %25 = arith.truncf %23 : vector<8x32xf32> to vector<8x32xbf16>
    %cst_13 = arith.constant dense<0.000000e+00> : vector<8x128xf32>
    %26 = tpu.matmul %25, %24, %cst_13 {dimension_numbers = #tpu.dot_dimension_numbers<[1], [0], [0], [1], [0, 0, 1, 1], [], []>} : vector<8x32xbf16>, vector<32x128xbf16>, vector<8x128xf32> -> vector<8x128xf32>
    %27 = arith.addf %15, %26 : vector<8x128xf32>
    %28 = vector.extract_strided_slice %0 {offsets = [0, 2], sizes = [8, 1], strides = [1, 1]} : vector<8x8xi32> to vector<8x1xi32>
    %29 = vector.broadcast %28 : vector<8x1xi32> to vector<8x32xi32>
    %30 = arith.cmpi eq, %29, %2 : vector<8x32xi32>
    %cst_14 = arith.constant 1.000000e+00 : f32
    %cst_15 = arith.constant 0.000000e+00 : f32
    %31 = vector.broadcast %cst_14 : f32 to vector<8x32xf32>
    %32 = vector.broadcast %cst_15 : f32 to vector<8x32xf32>
    %33 = arith.select %30, %31, %32 : vector<8x32xi1>, vector<8x32xf32>
    %34 = arith.truncf %33 : vector<8x32xf32> to vector<8x32xbf16>
    %cst_16 = arith.constant dense<0.000000e+00> : vector<8x32xf32>
    %35 = tpu.matmul %34, %1, %cst_16 {dimension_numbers = #tpu.dot_dimension_numbers<[1], [0], [0], [1], [0, 0, 1, 1], [], []>} : vector<8x32xbf16>, vector<32x32xbf16>, vector<8x32xf32> -> vector<8x32xf32>
    %c64 = arith.constant 64 : index
    %c0_17 = arith.constant 0 : index
    %36 = vector.load %arg3[%c64, %c0_17] : memref<256x128xbf16, #tpu.memory_space<vmem>>, vector<32x128xbf16>
    %37 = arith.truncf %35 : vector<8x32xf32> to vector<8x32xbf16>
    %cst_18 = arith.constant dense<0.000000e+00> : vector<8x128xf32>
    %38 = tpu.matmul %37, %36, %cst_18 {dimension_numbers = #tpu.dot_dimension_numbers<[1], [0], [0], [1], [0, 0, 1, 1], [], []>} : vector<8x32xbf16>, vector<32x128xbf16>, vector<8x128xf32> -> vector<8x128xf32>
    %39 = arith.addf %27, %38 : vector<8x128xf32>
    %40 = vector.extract_strided_slice %0 {offsets = [0, 3], sizes = [8, 1], strides = [1, 1]} : vector<8x8xi32> to vector<8x1xi32>
    %41 = vector.broadcast %40 : vector<8x1xi32> to vector<8x32xi32>
    %42 = arith.cmpi eq, %41, %2 : vector<8x32xi32>
    %cst_19 = arith.constant 1.000000e+00 : f32
    %cst_20 = arith.constant 0.000000e+00 : f32
    %43 = vector.broadcast %cst_19 : f32 to vector<8x32xf32>
    %44 = vector.broadcast %cst_20 : f32 to vector<8x32xf32>
    %45 = arith.select %42, %43, %44 : vector<8x32xi1>, vector<8x32xf32>
    %46 = arith.truncf %45 : vector<8x32xf32> to vector<8x32xbf16>
    %cst_21 = arith.constant dense<0.000000e+00> : vector<8x32xf32>
    %47 = tpu.matmul %46, %1, %cst_21 {dimension_numbers = #tpu.dot_dimension_numbers<[1], [0], [0], [1], [0, 0, 1, 1], [], []>} : vector<8x32xbf16>, vector<32x32xbf16>, vector<8x32xf32> -> vector<8x32xf32>
    %c96 = arith.constant 96 : index
    %c0_22 = arith.constant 0 : index
    %48 = vector.load %arg3[%c96, %c0_22] : memref<256x128xbf16, #tpu.memory_space<vmem>>, vector<32x128xbf16>
    %49 = arith.truncf %47 : vector<8x32xf32> to vector<8x32xbf16>
    %cst_23 = arith.constant dense<0.000000e+00> : vector<8x128xf32>
    %50 = tpu.matmul %49, %48, %cst_23 {dimension_numbers = #tpu.dot_dimension_numbers<[1], [0], [0], [1], [0, 0, 1, 1], [], []>} : vector<8x32xbf16>, vector<32x128xbf16>, vector<8x128xf32> -> vector<8x128xf32>
    %51 = arith.addf %39, %50 : vector<8x128xf32>
    %52 = vector.extract_strided_slice %0 {offsets = [0, 4], sizes = [8, 1], strides = [1, 1]} : vector<8x8xi32> to vector<8x1xi32>
    %53 = vector.broadcast %52 : vector<8x1xi32> to vector<8x32xi32>
    %54 = arith.cmpi eq, %53, %2 : vector<8x32xi32>
    %cst_24 = arith.constant 1.000000e+00 : f32
    %cst_25 = arith.constant 0.000000e+00 : f32
    %55 = vector.broadcast %cst_24 : f32 to vector<8x32xf32>
    %56 = vector.broadcast %cst_25 : f32 to vector<8x32xf32>
    %57 = arith.select %54, %55, %56 : vector<8x32xi1>, vector<8x32xf32>
    %58 = arith.truncf %57 : vector<8x32xf32> to vector<8x32xbf16>
    %cst_26 = arith.constant dense<0.000000e+00> : vector<8x32xf32>
    %59 = tpu.matmul %58, %1, %cst_26 {dimension_numbers = #tpu.dot_dimension_numbers<[1], [0], [0], [1], [0, 0, 1, 1], [], []>} : vector<8x32xbf16>, vector<32x32xbf16>, vector<8x32xf32> -> vector<8x32xf32>
    %c128 = arith.constant 128 : index
    %c0_27 = arith.constant 0 : index
    %60 = vector.load %arg3[%c128, %c0_27] : memref<256x128xbf16, #tpu.memory_space<vmem>>, vector<32x128xbf16>
    %61 = arith.truncf %59 : vector<8x32xf32> to vector<8x32xbf16>
    %cst_28 = arith.constant dense<0.000000e+00> : vector<8x128xf32>
    %62 = tpu.matmul %61, %60, %cst_28 {dimension_numbers = #tpu.dot_dimension_numbers<[1], [0], [0], [1], [0, 0, 1, 1], [], []>} : vector<8x32xbf16>, vector<32x128xbf16>, vector<8x128xf32> -> vector<8x128xf32>
    %63 = arith.addf %51, %62 : vector<8x128xf32>
    %64 = vector.extract_strided_slice %0 {offsets = [0, 5], sizes = [8, 1], strides = [1, 1]} : vector<8x8xi32> to vector<8x1xi32>
    %65 = vector.broadcast %64 : vector<8x1xi32> to vector<8x32xi32>
    %66 = arith.cmpi eq, %65, %2 : vector<8x32xi32>
    %cst_29 = arith.constant 1.000000e+00 : f32
    %cst_30 = arith.constant 0.000000e+00 : f32
    %67 = vector.broadcast %cst_29 : f32 to vector<8x32xf32>
    %68 = vector.broadcast %cst_30 : f32 to vector<8x32xf32>
    %69 = arith.select %66, %67, %68 : vector<8x32xi1>, vector<8x32xf32>
    %70 = arith.truncf %69 : vector<8x32xf32> to vector<8x32xbf16>
    %cst_31 = arith.constant dense<0.000000e+00> : vector<8x32xf32>
    %71 = tpu.matmul %70, %1, %cst_31 {dimension_numbers = #tpu.dot_dimension_numbers<[1], [0], [0], [1], [0, 0, 1, 1], [], []>} : vector<8x32xbf16>, vector<32x32xbf16>, vector<8x32xf32> -> vector<8x32xf32>
    %c160 = arith.constant 160 : index
    %c0_32 = arith.constant 0 : index
    %72 = vector.load %arg3[%c160, %c0_32] : memref<256x128xbf16, #tpu.memory_space<vmem>>, vector<32x128xbf16>
    %73 = arith.truncf %71 : vector<8x32xf32> to vector<8x32xbf16>
    %cst_33 = arith.constant dense<0.000000e+00> : vector<8x128xf32>
    %74 = tpu.matmul %73, %72, %cst_33 {dimension_numbers = #tpu.dot_dimension_numbers<[1], [0], [0], [1], [0, 0, 1, 1], [], []>} : vector<8x32xbf16>, vector<32x128xbf16>, vector<8x128xf32> -> vector<8x128xf32>
    %75 = arith.addf %63, %74 : vector<8x128xf32>
    %76 = vector.extract_strided_slice %0 {offsets = [0, 6], sizes = [8, 1], strides = [1, 1]} : vector<8x8xi32> to vector<8x1xi32>
    %77 = vector.broadcast %76 : vector<8x1xi32> to vector<8x32xi32>
    %78 = arith.cmpi eq, %77, %2 : vector<8x32xi32>
    %cst_34 = arith.constant 1.000000e+00 : f32
    %cst_35 = arith.constant 0.000000e+00 : f32
    %79 = vector.broadcast %cst_34 : f32 to vector<8x32xf32>
    %80 = vector.broadcast %cst_35 : f32 to vector<8x32xf32>
    %81 = arith.select %78, %79, %80 : vector<8x32xi1>, vector<8x32xf32>
    %82 = arith.truncf %81 : vector<8x32xf32> to vector<8x32xbf16>
    %cst_36 = arith.constant dense<0.000000e+00> : vector<8x32xf32>
    %83 = tpu.matmul %82, %1, %cst_36 {dimension_numbers = #tpu.dot_dimension_numbers<[1], [0], [0], [1], [0, 0, 1, 1], [], []>} : vector<8x32xbf16>, vector<32x32xbf16>, vector<8x32xf32> -> vector<8x32xf32>
    %c192 = arith.constant 192 : index
    %c0_37 = arith.constant 0 : index
    %84 = vector.load %arg3[%c192, %c0_37] : memref<256x128xbf16, #tpu.memory_space<vmem>>, vector<32x128xbf16>
    %85 = arith.truncf %83 : vector<8x32xf32> to vector<8x32xbf16>
    %cst_38 = arith.constant dense<0.000000e+00> : vector<8x128xf32>
    %86 = tpu.matmul %85, %84, %cst_38 {dimension_numbers = #tpu.dot_dimension_numbers<[1], [0], [0], [1], [0, 0, 1, 1], [], []>} : vector<8x32xbf16>, vector<32x128xbf16>, vector<8x128xf32> -> vector<8x128xf32>
    %87 = arith.addf %75, %86 : vector<8x128xf32>
    %88 = vector.extract_strided_slice %0 {offsets = [0, 7], sizes = [8, 1], strides = [1, 1]} : vector<8x8xi32> to vector<8x1xi32>
    %89 = vector.broadcast %88 : vector<8x1xi32> to vector<8x32xi32>
    %90 = arith.cmpi eq, %89, %2 : vector<8x32xi32>
    %cst_39 = arith.constant 1.000000e+00 : f32
    %cst_40 = arith.constant 0.000000e+00 : f32
    %91 = vector.broadcast %cst_39 : f32 to vector<8x32xf32>
    %92 = vector.broadcast %cst_40 : f32 to vector<8x32xf32>
    %93 = arith.select %90, %91, %92 : vector<8x32xi1>, vector<8x32xf32>
    %94 = arith.truncf %93 : vector<8x32xf32> to vector<8x32xbf16>
    %cst_41 = arith.constant dense<0.000000e+00> : vector<8x32xf32>
    %95 = tpu.matmul %94, %1, %cst_41 {dimension_numbers = #tpu.dot_dimension_numbers<[1], [0], [0], [1], [0, 0, 1, 1], [], []>} : vector<8x32xbf16>, vector<32x32xbf16>, vector<8x32xf32> -> vector<8x32xf32>
    %c224 = arith.constant 224 : index
    %c0_42 = arith.constant 0 : index
    %96 = vector.load %arg3[%c224, %c0_42] : memref<256x128xbf16, #tpu.memory_space<vmem>>, vector<32x128xbf16>
    %97 = arith.truncf %95 : vector<8x32xf32> to vector<8x32xbf16>
    %cst_43 = arith.constant dense<0.000000e+00> : vector<8x128xf32>
    %98 = tpu.matmul %97, %96, %cst_43 {dimension_numbers = #tpu.dot_dimension_numbers<[1], [0], [0], [1], [0, 0, 1, 1], [], []>} : vector<8x32xbf16>, vector<32x128xbf16>, vector<8x128xf32> -> vector<8x128xf32>
    %99 = arith.addf %87, %98 : vector<8x128xf32>
    %c0_44 = arith.constant 0 : index
    %c0_45 = arith.constant 0 : index
    %100 = vector.load %arg4[%c0_44, %c0_45] : memref<1x128xf32, #tpu.memory_space<vmem>>, vector<1x128xf32>
    %101 = vector.broadcast %100 : vector<1x128xf32> to vector<8x128xf32>
    %102 = arith.addf %99, %101 : vector<8x128xf32>
    %cst_46 = arith.constant 0.000000e+00 : f32
    %103 = vector.broadcast %cst_46 : f32 to vector<8x128xf32>
    %104 = arith.maximumf %102, %103 : vector<8x128xf32>
    %c0_47 = arith.constant 0 : index
    %c0_48 = arith.constant 0 : index
    %105 = vector.load %arg5[%c0_47, %c0_48] : memref<1x128xf32, #tpu.memory_space<vmem>>, vector<1x128xf32>
    %106 = vector.broadcast %105 : vector<1x128xf32> to vector<8x128xf32>
    %107 = arith.mulf %104, %106 : vector<8x128xf32>
    %cst_49 = arith.constant dense<0.000000e+00> : vector<8xf32>
    %108 = vector.multi_reduction <add>, %107, %cst_49 [1] : vector<8x128xf32> to vector<8xf32>
    %109 = vector.shape_cast %108 : vector<8xf32> to vector<8x1xf32>
    %c0_50 = arith.constant 0 : index
    %c0_51 = arith.constant 0 : index
    %110 = memref.load %arg6[%c0_50, %c0_51] : memref<1x1xf32, #tpu.memory_space<smem>>
    %111 = vector.broadcast %110 : f32 to vector<8x1xf32>
    %112 = arith.addf %109, %111 : vector<8x1xf32>
    %c0_52 = arith.constant 0 : index
    %c0_53 = arith.constant 0 : index
    %113 = vector.load %arg7[%c0_52, %c0_53] : memref<8x1xf32, #tpu.memory_space<vmem>>, vector<8x1xf32>
    tpu.vector_store %arg7[%c0_52, %c0_53], %112 {strides = array<i32>} : memref<8x1xf32, #tpu.memory_space<vmem>>, vector<8x1xf32>,
    return
  }
  func.func @transform_0(%arg0: i32) -> (i32, i32) {
    %c0_i32 = arith.constant 0 : i32
    %c0_i32_0 = arith.constant 0 : i32
    return %arg0, %c0_i32 : i32, i32
  }
  func.func @transform_1(%arg0: i32) -> (i32, i32) {
    %c0_i32 = arith.constant 0 : i32
    %c0_i32_0 = arith.constant 0 : i32
    %c0_i32_1 = arith.constant 0 : i32
    return %c0_i32, %c0_i32_0 : i32, i32
  }
  func.func @transform_2(%arg0: i32) -> (i32, i32) {
    %c0_i32 = arith.constant 0 : i32
    %c0_i32_0 = arith.constant 0 : i32
    %c0_i32_1 = arith.constant 0 : i32
    return %c0_i32, %c0_i32_0 : i32, i32
  }
  func.func @transform_3(%arg0: i32) -> (i32, i32) {
    %c0_i32 = arith.constant 0 : i32
    %c0_i32_0 = arith.constant 0 : i32
    %c0_i32_1 = arith.constant 0 : i32
    return %c0_i32, %c0_i32_0 : i32, i32
  }
  func.func @transform_4(%arg0: i32) -> (i32, i32) {
    %c0_i32 = arith.constant 0 : i32
    %c0_i32_0 = arith.constant 0 : i32
    %c0_i32_1 = arith.constant 0 : i32
    return %c0_i32, %c0_i32_0 : i32, i32
  }
  func.func @transform_5(%arg0: i32) -> (i32, i32) {
    %c0_i32 = arith.constant 0 : i32
    %c0_i32_0 = arith.constant 0 : i32
    %c0_i32_1 = arith.constant 0 : i32
    return %c0_i32, %c0_i32_0 : i32, i32
  }
  func.func @transform_6(%arg0: i32) -> (i32, i32) {
    %c0_i32 = arith.constant 0 : i32
    %c0_i32_0 = arith.constant 0 : i32
    return %arg0, %c0_i32 : i32, i32
  }
}

</mosaic_0001>

<bundles_post_ra>
// kernel: tpu_custom_call.1
= control target key start
LH: loop header
LB: loop body
LE: loop exit
PB: predicated region body
PF: predicated region fallthrough
CT: control target
= control target key end

     0   :  { %12 = vsyncpa [#allocation4], 0  ;;  %s1541_s0 = inlined_call_operand.hbm [shape: s32[8,8], index: 0, kind: input, shape index: {}]   ;;  %s1542_s1 = inlined_call_operand.hbm [shape: bf16[32,32], index: 1, kind: input, shape index: {}]   ;;  %s1543_s2 = inlined_call_operand.hbm [shape: bf16[256,128], index: 2, kind: input, shape index: {}]   ;;  %s1544_s3 = inlined_call_operand.vmem [shape: f32[1,128], index: 3, kind: input, shape index: {}]   ;;  %s1545_s4 = inlined_call_operand.vmem [shape: f32[1,128], index: 4, kind: input, shape index: {}]   ;;  %s1546_s5 = inlined_call_operand.<no memory space> [shape: f32[1,1], index: 5, kind: input, shape index: {}]   ;;  %s1547_s6 = inlined_call_operand.vmem [shape: f32[8,1], index: 6, kind: output, shape index: {}]  }
   0x1   :  { %13 = vsyncpa [#allocation6], 0  ;;  %s1316_s21 = smov [#allocation5]   ;;  %s1246_s25 = scalar_lea.hbm %s1542_s1, 256 }
   0x2   :  { %s29_s22 = sshll.u32 %s1316_s21, 4  ;;  %p1247_p0 = scmp.ne.s32.totalorder %s1542_s1, %s1246_s25  ;;  %s30_s22 = int_to_ptr.vmem [resolvable:$true] %s29_s22 }
   0x3   :  { %p1250_p1 = scmp.lt.u32.totalorder %s1246_s25, %s1542_s1 }
   0x5   :  { %p1252_p2 = pnand %p1250_p1, %p1247_p0 }
   0x7   :  { %1255 = shalt.err (!%p1252_p2)
}
   0x8   :  { %s1256_s30 = scalar_lea.vmem %s30_s22, 256  ;;  %p1261_p4 = scmp.lt.s32.totalorder %s30_s22, %s30_s22 }
   0x9   :  { %p1257_p3 = scmp.ne.s32.totalorder %s30_s22, %s1256_s30  ;;  %p1262_p5 = scmp.lt.s32.totalorder %s1256_s30, %s1256_s30 }
   0xb   :  { %p1263_p6 = por %p1262_p5, %p1261_p4 }
   0xd   :  { %p1264_p7 = pnand %p1263_p6, %p1257_p3 }
   0xf   :  { %1267 = shalt.err (!%p1264_p7)
}
  0x10   :  { %s1317_s7 = smov 64   ;;  %s1318_s8 = smov 4  }
  0x11   :  { %35 = dma.hbm_to_vmem [thread:$0]  %s1542_s1, 256, %s30_s22, [#allocation6], %s1317_s7, %s1317_s7, %s1318_s8  }
  0x12   :  { %s1319_s11 = smov [#allocation3]   ;;  %s1320_s13 = smov [#allocation7]  }
  0x13   :  { %s20_s12 = sshll.u32 %s1319_s11, 4  ;;  %s41_s14 = sshll.u32 %s1320_s13, 4  ;;  %s21_s12 = int_to_ptr.vmem [resolvable:$true] %s20_s12  ;;  %s42_s14 = int_to_ptr.vmem [resolvable:$true] %s41_s14 }
  0x14   :  { %s1268_s17 = scalar_lea.hbm %s1541_s0, 128 }
  0x15   :  { %p1269_p8 = scmp.ne.s32.totalorder %s1541_s0, %s1268_s17  ;;  %p1272_p9 = scmp.lt.u32.totalorder %s1268_s17, %s1541_s0 }
  0x17   :  { %p1274_p10 = pnand %p1272_p9, %p1269_p8 }
  0x19   :  { %1277 = shalt.err (!%p1274_p10)
}
  0x1a   :  { %s1278_s1 = scalar_lea.vmem %s21_s12, 128  ;;  %p1283_p12 = scmp.lt.s32.totalorder %s21_s12, %s21_s12 }
  0x1b   :  { %p1279_p11 = scmp.ne.s32.totalorder %s21_s12, %s1278_s1  ;;  %p1284_p13 = scmp.lt.s32.totalorder %s1278_s1, %s1278_s1 }
  0x1d   :  { %p1285_p0 = por %p1284_p13, %p1283_p12 }
  0x1f   :  { %p1286_p1 = pnand %p1285_p0, %p1279_p11 }
  0x21   :  { %1289 = shalt.err (!%p1286_p1)
}
  0x22   :  { %23 = dma.hbm_to_vmem [thread:$0]  %s1541_s0, 128, %s21_s12, [#allocation4]  }
  0x23   :  { %s1290_s26 = scalar_lea.hbm %s1543_s2, 2048 }
  0x24   :  { %p1291_p2 = scmp.ne.s32.totalorder %s1543_s2, %s1290_s26  ;;  %p1294_p3 = scmp.lt.u32.totalorder %s1290_s26, %s1543_s2 }
  0x26   :  { %p1296_p4 = pnand %p1294_p3, %p1291_p2 }
  0x28   :  { %1299 = shalt.err (!%p1296_p4)
}
  0x29   :  { %s1300_s9 = scalar_lea.vmem %s42_s14, 2048  ;;  %p1305_p6 = scmp.lt.s32.totalorder %s42_s14, %s42_s14 }
  0x2a   :  { %p1301_p5 = scmp.ne.s32.totalorder %s42_s14, %s1300_s9  ;;  %p1306_p7 = scmp.lt.s32.totalorder %s1300_s9, %s1300_s9 }
  0x2c   :  { %p1307_p8 = por %p1306_p7, %p1305_p6 }
  0x2e   :  { %p1308_p9 = pnand %p1307_p8, %p1301_p5 }
  0x30   :  { %1311 = shalt.err (!%p1308_p9)
}
  0x31   :  { %47 = dma.hbm_to_vmem [thread:$0]  %s1543_s2, 2048, %s42_s14, [#allocation6], %s1317_s7, %s1317_s7, %s1318_s8  }
  0x32   :  { %1312 = dma.done.wait [#allocation4], 128  }
  0x33   :  { %1313 = vsyncadd [#allocation4], 4294967168 }
  0x34   :  { %1314 = dma.done.wait [#allocation6], 2304  }
  0x35   :  { %1315 = vsyncadd [#allocation6], 4294964992  ;;  %v1321_v0 = vmov 1   ;;  %v1322_v1 = vmov 0.0   ;;  %v64_v2 = vld [vmem:[#allocation3] sm:$0xff]  ;;  %v1410_v3 = vld [vmem:[#allocation5] sm:$0xff]   ;;  %v69_v12 = vlaneseq }
  0x36   :  { %1219 = vset.pattern.permute.xlu0 %v1321_v0  ;;  %1084 = vmatprep.subr.bf16.mxu1 %v1322_v1  ;;  %v1413_v4 = vld [vmem:[#allocation5 + $0x8] sm:$0xff]   ;;  %vm1323_vm0 = vmmov 0   ;;  %v1324_v5 = vmov 0   ;;  %v1325_v6 = vmov 2   ;;  %v1326_v7 = vmov 5   ;;  %v1230_v19 = vld [vmem:[#allocation7 + $0x10] sm:$0xff]  }
  0x37   :  { %1076 = vmatprep.subr.bf16.mxu0 %v1322_v1  ;;  %139 = vperm.xlu0 %1219, %v64_v2   ;;  %v1327_v8 = vmov 3   ;;  %v1328_v9 = vmov 7   ;;  %v1329_v10 = vmov 4   ;;  %v1330_v11 = vmov 6   ;;  %v1231_v21 = vld [vmem:[#allocation7 + $0x18] sm:$0xff]   ;;  %v1232_v22 = vld [vmem:[#allocation7] sm:$0xff]  }
  0x38   :  { %1085 = vmatpush3.bf16.msra.mxu1 %v1410_v3  ;;  %1077 = vmatpush3.bf16.msra.mxu0 %v1410_v3  ;;  %v1426_v13 = vand.u32 127, %v69_v12  ;;  %vm89_vm2 = vcmask 261120   ;;  %v1233_v23 = vld [vmem:[#allocation7 + $0x8] sm:$0xff]   ;;  %v1234_v52 = vld [vmem:[#allocation7 + $0x20] sm:$0xff]   ;;  %v1236_v63 = vld [vmem:[#allocation7 + $0x30] sm:$0xff]   ;;  %vm984_vm10 = vcmask 7168  }
  0x39   :  { %1086 = vmatprep.subr.bf16.mxu1 %v1322_v1  ;;  %1088 = vmatprep.mubr.msk.bf16.mxu1 %vm1323_vm0, %v1322_v1  ;;  %v1235_v53 = vld [vmem:[#allocation7 + $0x28] sm:$0xff]  }
  0x3a   :  { %1078 = vmatprep.subr.bf16.mxu0 %v1322_v1  ;;  %1080 = vmatprep.mubr.msk.bf16.mxu0 %vm1323_vm0, %v1322_v1 }
  0x3b   :  { %1220 = vset.pattern.permute.xlu0 %v1324_v5  ;;  %1221 = vset.pattern.permute.xlu1 %v1325_v6  ;;  %v1237_v6 = vld [vmem:[#allocation7 + $0x38] sm:$0xff]  }
  0x3c   :  { %72 = vperm.xlu0 %1220, %v64_v2   ;;  %1087 = vmatpush3.bf16.msra.mxu1 %v1413_v4 }
  0x3d   :  { %1079 = vmatpush3.bf16.msra.mxu0 %v1413_v4  ;;  %1100 = vmatprep.subr.bf16.mxu1 %v1322_v1 }
  0x3e   :  { %1092 = vmatprep.subr.bf16.mxu0 %v1322_v1  ;;  %303 = vperm.xlu1 %1221, %v64_v2  }
  0x40   :  { %1224 = vset.pattern.permute.xlu0 %v1326_v7 }
  0x41   :  { %633 = vperm.xlu0 %1224, %v64_v2  }
  0x42   :  { %1222 = vset.pattern.permute.xlu1 %v1327_v8  ;;  %v1238_v8 = vld [vmem:[#allocation7 + $0x40] sm:$0xff]  }
  0x43   :  { %413 = vperm.xlu1 %1222, %v64_v2  }
  0x45   :  { %1227 = vset.pattern.permute.xlu0 %v1328_v9 }
  0x47   :  { %1223 = vset.pattern.permute.xlu1 %v1329_v10 }
  0x48   :  { %523 = vperm.xlu1 %1223, %v64_v2  }
  0x4c   :  { %1225 = vset.pattern.permute.xlu1 %v1330_v11 }
  0x4d   :  { %743 = vperm.xlu1 %1225, %v64_v2  }
  0x51   :  { %1226 = vset.pattern.permute.xlu1 %v1328_v9 }
  0x52   :  { %853 = vperm.xlu1 %1226, %v64_v2  }
  0xb6   :  { %v140_v14 = vpop.permute.xlu0 %139 }
  0xb7   :  { %vm141_vm1 = vcmp.eq.s32.totalorder %v140_v14, %v1426_v13 }
  0xb8   :  { %v142_v15 = vsel %vm141_vm1, 1.0, %v1322_v1 }
  0xb9   :  { %v143_v16 = vpack.c.bf16 %v142_v15, %v142_v15  ;;  %v1240_v15 = vld [vmem:[#allocation7 + $0x50] sm:$0xff]  }
  0xbb   :  { %1089 = vmatmul.mubr.msk.bf16.vlgmr.msra.gmra.mrb[0].mxu1 %vm89_vm2, %v143_v16  ;;  %v73_v17 = vpop.permute.xlu0 %72 }
  0xbc   :  { %vm74_vm3 = vcmp.eq.s32.totalorder %v73_v17, %v1426_v13  ;;  %1104 = vmatprep.mubr.msk.bf16.mxu1 %vm1323_vm0, %v1322_v1  ;;  %1101 = vmatpush3.bf16.msra.mxu1 %v1232_v22  ;;  %v1242_v22 = vld [vmem:[#allocation7 + $0x60] sm:$0xff]  }
  0xbd   :  { %v75_v18 = vsel %vm74_vm3, 1.0, %v1322_v1  ;;  %1102 = vmatprep.subr.bf16.mxu1 %v1322_v1  ;;  %v304_v24 = vpop.permute.xlu1 %303 }
  0xbe   :  { %v76_v20 = vpack.c.bf16 %v75_v18, %v75_v18  ;;  %vm305_vm4 = vcmp.eq.s32.totalorder %v304_v24, %v1426_v13 }
  0xbf   :  { %v306_v30 = vsel %vm305_vm4, 1.0, %v1322_v1 }
  0xc0   :  { %1081 = vmatmul.mubr.msk.bf16.vlgmr.msra.gmra.mrb[0].mxu0 %vm89_vm2, %v76_v20  ;;  %1103 = vmatpush3.bf16.msra.mxu1 %v1233_v23  ;;  %v307_v35 = vpack.c.bf16 %v306_v30, %v306_v30  ;;  %v634_v42 = vpop.permute.xlu0 %633  ;;  %v1241_v20 = vld [vmem:[#allocation7 + $0x58] sm:$0xff]  }
  0xc1   :  { %1093 = vmatpush3.bf16.msra.mxu0 %v1230_v19  ;;  %1096 = vmatprep.mubr.msk.bf16.mxu0 %vm1323_vm0, %v1322_v1  ;;  %vm635_vm7 = vcmp.eq.s32.totalorder %v634_v42, %v1426_v13 }
  0xc2   :  { %1094 = vmatprep.subr.bf16.mxu0 %v1322_v1  ;;  %1116 = vmatprep.subr.bf16.mxu1 %v1322_v1  ;;  %v414_v33 = vpop.permute.xlu1 %413  ;;  %v636_v44 = vsel %vm635_vm7, 1.0, %v1322_v1 }
  0xc3   :  { %vm415_vm5 = vcmp.eq.s32.totalorder %v414_v33, %v1426_v13  ;;  %v637_v46 = vpack.c.bf16 %v636_v44, %v636_v44 }
  0xc4   :  { %v416_v38 = vsel %vm415_vm5, 1.0, %v1322_v1 }
  0xc5   :  { %1095 = vmatpush3.bf16.msra.mxu0 %v1231_v21  ;;  %v417_v40 = vpack.c.bf16 %v416_v38, %v416_v38 }
  0xc6   :  { %1108 = vmatprep.subr.bf16.mxu0 %v1322_v1 }
  0xc7   :  { %v524_v39 = vpop.permute.xlu1 %523 }
  0xc8   :  { %vm525_vm6 = vcmp.eq.s32.totalorder %v524_v39, %v1426_v13 }
  0xc9   :  { %v526_v41 = vsel %vm525_vm6, 1.0, %v1322_v1 }
  0xca   :  { %v527_v43 = vpack.c.bf16 %v526_v41, %v526_v41 }
  0xcc   :  { %v744_v45 = vpop.permute.xlu1 %743 }
  0xcd   :  { %vm745_vm8 = vcmp.eq.s32.totalorder %v744_v45, %v1426_v13 }
  0xce   :  { %v746_v47 = vsel %vm745_vm8, 1.0, %v1322_v1 }
  0xcf   :  { %v747_v49 = vpack.c.bf16 %v746_v47, %v746_v47 }
  0xd1   :  { %v854_v48 = vpop.permute.xlu1 %853 }
  0xd2   :  { %vm855_vm9 = vcmp.eq.s32.totalorder %v854_v48, %v1426_v13  ;;  %v1239_v13 = vld [vmem:[#allocation7 + $0x48] sm:$0xff]  }
  0xd3   :  { %v856_v50 = vsel %vm855_vm9, 1.0, %v1322_v1 }
  0xd4   :  { %v857_v51 = vpack.c.bf16 %v856_v50, %v856_v50 }
 0x18e   :  { %v181_v25 = vpop.f32.mrb[0].mxu1 }
 0x18f   :  { %v191_v26 = vpack.c.bf16 %v181_v25, %v181_v25  ;;  %v1090_v27 = vpop.f32.mrb[1].mxu1 }
 0x190   :  { %v184_v28 = vpop.f32.mrb[2].mxu1  ;;  %v1243_v27 = vld [vmem:[#allocation7 + $0x68] sm:$0xff]  }
 0x191   :  { %v1091_v29 = vpop.f32.mrb[3].mxu1  ;;  %1097 = vmatmul.mubr.msk.bf16.vlgmr.msra.gmra.mrb[4].mxu0 %vm89_vm2, %v191_v26 }
 0x192   :  { %1109 = vmatpush3.bf16.msra.mxu0 %v1410_v3  ;;  %1112 = vmatprep.mubr.msk.bf16.mxu0 %vm1323_vm0, %v1322_v1  ;;  %v1244_v29 = vld [vmem:[#allocation7 + $0x70] sm:$0xff]  }
 0x193   :  { %v127_v31 = vpop.f32.mrb[0].mxu0  ;;  %1110 = vmatprep.subr.bf16.mxu0 %v1322_v1 }
 0x194   :  { %v137_v32 = vpack.c.bf16 %v127_v31, %v127_v31  ;;  %v1082_v34 = vpop.f32.mrb[1].mxu0 }
 0x195   :  { %v130_v36 = vpop.f32.mrb[2].mxu0  ;;  %v1245_v34 = vld [vmem:[#allocation7 + $0x78] sm:$0xff]  }
 0x196   :  { %1111 = vmatpush3.bf16.msra.mxu0 %v1413_v4  ;;  %1105 = vmatmul.mubr.msk.bf16.vlgmr.msra.gmra.mrb[4].mxu1 %vm89_vm2, %v137_v32  ;;  %v1083_v37 = vpop.f32.mrb[3].mxu0 }
 0x197   :  { %1124 = vmatprep.subr.bf16.mxu0 %v1322_v1  ;;  %1120 = vmatprep.mubr.msk.bf16.mxu1 %vm1323_vm0, %v1322_v1 }
 0x198   :  { %1117 = vmatpush3.bf16.msra.mxu1 %v1234_v52 }
 0x199   :  { %1113 = vmatmul.mubr.msk.bf16.vlgmr.msra.gmra.mrb[8].mxu0 %vm89_vm2, %v307_v35  ;;  %1118 = vmatprep.subr.bf16.mxu1 %v1322_v1 }
 0x19a   :  { %1125 = vmatpush3.bf16.msra.mxu0 %v1410_v3  ;;  %1128 = vmatprep.mubr.msk.bf16.mxu0 %vm1323_vm0, %v1322_v1 }
 0x19b   :  { %1126 = vmatprep.subr.bf16.mxu0 %v1322_v1 }
 0x19c   :  { %1119 = vmatpush3.bf16.msra.mxu1 %v1235_v53 }
 0x19d   :  { %1132 = vmatprep.subr.bf16.mxu1 %v1322_v1 }
 0x19e   :  { %1127 = vmatpush3.bf16.msra.mxu0 %v1413_v4 }
 0x19f   :  { %1140 = vmatprep.subr.bf16.mxu0 %v1322_v1 }
 0x1a1   :  { %1129 = vmatmul.mubr.msk.bf16.vlgmr.msra.gmra.mrb[12].mxu0 %vm89_vm2, %v417_v40 }
 0x1a2   :  { %1141 = vmatpush3.bf16.msra.mxu0 %v1410_v3  ;;  %1144 = vmatprep.mubr.msk.bf16.mxu0 %vm1323_vm0, %v1322_v1 }
 0x1a3   :  { %1142 = vmatprep.subr.bf16.mxu0 %v1322_v1 }
 0x1a6   :  { %1143 = vmatpush3.bf16.msra.mxu0 %v1413_v4 }
 0x1a7   :  { %1156 = vmatprep.subr.bf16.mxu0 %v1322_v1 }
 0x1a9   :  { %1145 = vmatmul.mubr.msk.bf16.vlgmr.msra.gmra.mrb[16].mxu0 %vm89_vm2, %v527_v43 }
 0x1aa   :  { %1157 = vmatpush3.bf16.msra.mxu0 %v1410_v3  ;;  %1160 = vmatprep.mubr.msk.bf16.mxu0 %vm1323_vm0, %v1322_v1 }
 0x1ab   :  { %1158 = vmatprep.subr.bf16.mxu0 %v1322_v1 }
 0x1ae   :  { %1159 = vmatpush3.bf16.msra.mxu0 %v1413_v4 }
 0x1af   :  { %1172 = vmatprep.subr.bf16.mxu0 %v1322_v1 }
 0x1b1   :  { %1161 = vmatmul.mubr.msk.bf16.vlgmr.msra.gmra.mrb[20].mxu0 %vm89_vm2, %v637_v46 }
 0x1b2   :  { %1173 = vmatpush3.bf16.msra.mxu0 %v1410_v3  ;;  %1176 = vmatprep.mubr.msk.bf16.mxu0 %vm1323_vm0, %v1322_v1 }
 0x1b3   :  { %1174 = vmatprep.subr.bf16.mxu0 %v1322_v1 }
 0x1b6   :  { %1175 = vmatpush3.bf16.msra.mxu0 %v1413_v4 }
 0x1b7   :  { %1188 = vmatprep.subr.bf16.mxu0 %v1322_v1 }
 0x1b9   :  { %1177 = vmatmul.mubr.msk.bf16.vlgmr.msra.gmra.mrb[24].mxu0 %vm89_vm2, %v747_v49 }
 0x1ba   :  { %1189 = vmatpush3.bf16.msra.mxu0 %v1410_v3  ;;  %1192 = vmatprep.mubr.msk.bf16.mxu0 %vm1323_vm0, %v1322_v1 }
 0x1bb   :  { %1190 = vmatprep.subr.bf16.mxu0 %v1322_v1 }
 0x1be   :  { %1191 = vmatpush3.bf16.msra.mxu0 %v1413_v4 }
 0x1c1   :  { %1193 = vmatmul.mubr.msk.bf16.vlgmr.msra.gmra.mrb[28].mxu0 %vm89_vm2, %v857_v51 }
 0x264   :  { %v241_v54 = vpop.f32.mrb[4].mxu0 }
 0x265   :  { %v1098_v55 = vpop.f32.mrb[5].mxu0 }
 0x266   :  { %v244_v56 = vpop.f32.mrb[6].mxu0 }
 0x267   :  { %v1099_v57 = vpop.f32.mrb[7].mxu0 }
 0x269   :  { %v296_v58 = vpop.f32.mrb[4].mxu1 }
 0x26a   :  { %v1501_v59 = vadd.f32 %v296_v58, %v241_v54  ;;  %v1106_v60 = vpop.f32.mrb[5].mxu1 }
 0x26b   :  { %v299_v61 = vpop.f32.mrb[6].mxu1 }
 0x26c   :  { %v345_v62 = vpop.f32.mrb[8].mxu0  ;;  %v1107_v0 = vpop.f32.mrb[7].mxu1 }
 0x26d   :  { %v355_v2 = vpack.c.bf16 %v345_v62, %v345_v62  ;;  %v1114_v3 = vpop.f32.mrb[9].mxu0 }
 0x26e   :  { %v348_v4 = vpop.f32.mrb[10].mxu0 }
 0x26f   :  { %v1115_v5 = vpop.f32.mrb[11].mxu0  ;;  %1121 = vmatmul.mubr.msk.bf16.vlgmr.msra.gmra.mrb[8].mxu1 %vm89_vm2, %v355_v2  ;;  %v1026_v2 = vld [vmem:[%s1544_s3] ss:$0 sm:$0xff] }
 0x270   :  { %1133 = vmatpush3.bf16.msra.mxu1 %v1236_v63  ;;  %1136 = vmatprep.mubr.msk.bf16.mxu1 %vm1323_vm0, %v1322_v1 }
 0x271   :  { %1134 = vmatprep.subr.bf16.mxu1 %v1322_v1 }
 0x274   :  { %1135 = vmatpush3.bf16.msra.mxu1 %v1237_v6  ;;  %v455_v7 = vpop.f32.mrb[12].mxu0 }
 0x275   :  { %v465_v9 = vpack.c.bf16 %v455_v7, %v455_v7  ;;  %v1130_v10 = vpop.f32.mrb[13].mxu0  ;;  %1148 = vmatprep.subr.bf16.mxu1 %v1322_v1 }
 0x276   :  { %v458_v11 = vpop.f32.mrb[14].mxu0 }
 0x277   :  { %v1131_v12 = vpop.f32.mrb[15].mxu0  ;;  %1137 = vmatmul.mubr.msk.bf16.vlgmr.msra.gmra.mrb[12].mxu1 %vm89_vm2, %v465_v9  ;;  %v982_v11 = vstv %s1546_s5 }
 0x278   :  { %1149 = vmatpush3.bf16.msra.mxu1 %v1238_v8  ;;  %1152 = vmatprep.mubr.msk.bf16.mxu1 %vm1323_vm0, %v1322_v1  ;;  %v1027_v8 = vld [vmem:[%s1545_s4] ss:$0 sm:$0xff] }
 0x279   :  { %1150 = vmatprep.subr.bf16.mxu1 %v1322_v1 }
 0x27c   :  { %1151 = vmatpush3.bf16.msra.mxu1 %v1239_v13  ;;  %v565_v14 = vpop.f32.mrb[16].mxu0 }
 0x27d   :  { %v575_v16 = vpack.c.bf16 %v565_v14, %v565_v14  ;;  %v1146_v17 = vpop.f32.mrb[17].mxu0  ;;  %1164 = vmatprep.subr.bf16.mxu1 %v1322_v1 }
 0x27e   :  { %v568_v18 = vpop.f32.mrb[18].mxu0 }
 0x27f   :  { %v1147_v19 = vpop.f32.mrb[19].mxu0  ;;  %1153 = vmatmul.mubr.msk.bf16.vlgmr.msra.gmra.mrb[16].mxu1 %vm89_vm2, %v575_v16 }
 0x280   :  { %1165 = vmatpush3.bf16.msra.mxu1 %v1240_v15  ;;  %1168 = vmatprep.mubr.msk.bf16.mxu1 %vm1323_vm0, %v1322_v1 }
 0x281   :  { %1166 = vmatprep.subr.bf16.mxu1 %v1322_v1 }
 0x284   :  { %1167 = vmatpush3.bf16.msra.mxu1 %v1241_v20  ;;  %v675_v21 = vpop.f32.mrb[20].mxu0 }
 0x285   :  { %v685_v23 = vpack.c.bf16 %v675_v21, %v675_v21  ;;  %v1162_v24 = vpop.f32.mrb[21].mxu0  ;;  %1180 = vmatprep.subr.bf16.mxu1 %v1322_v1 }
 0x286   :  { %v678_v25 = vpop.f32.mrb[22].mxu0 }
 0x287   :  { %v1163_v26 = vpop.f32.mrb[23].mxu0  ;;  %1169 = vmatmul.mubr.msk.bf16.vlgmr.msra.gmra.mrb[20].mxu1 %vm89_vm2, %v685_v23 }
 0x288   :  { %1181 = vmatpush3.bf16.msra.mxu1 %v1242_v22  ;;  %1184 = vmatprep.mubr.msk.bf16.mxu1 %vm1323_vm0, %v1322_v1 }
 0x289   :  { %1182 = vmatprep.subr.bf16.mxu1 %v1322_v1 }
 0x28c   :  { %1183 = vmatpush3.bf16.msra.mxu1 %v1243_v27  ;;  %v785_v28 = vpop.f32.mrb[24].mxu0 }
 0x28d   :  { %v795_v30 = vpack.c.bf16 %v785_v28, %v785_v28  ;;  %v1178_v31 = vpop.f32.mrb[25].mxu0  ;;  %1196 = vmatprep.subr.bf16.mxu1 %v1322_v1 }
 0x28e   :  { %v788_v32 = vpop.f32.mrb[26].mxu0 }
 0x28f   :  { %v1179_v33 = vpop.f32.mrb[27].mxu0  ;;  %1185 = vmatmul.mubr.msk.bf16.vlgmr.msra.gmra.mrb[24].mxu1 %vm89_vm2, %v795_v30 }
 0x290   :  { %1197 = vmatpush3.bf16.msra.mxu1 %v1244_v29  ;;  %1200 = vmatprep.mubr.msk.bf16.mxu1 %vm1323_vm0, %v1322_v1 }
 0x291   :  { %1198 = vmatprep.subr.bf16.mxu1 %v1322_v1 }
 0x294   :  { %1199 = vmatpush3.bf16.msra.mxu1 %v1245_v34  ;;  %v895_v35 = vpop.f32.mrb[28].mxu0 }
 0x295   :  { %v905_v36 = vpack.c.bf16 %v895_v35, %v895_v35  ;;  %v1194_v37 = vpop.f32.mrb[29].mxu0 }
 0x296   :  { %v898_v38 = vpop.f32.mrb[30].mxu0 }
 0x297   :  { %v1195_v39 = vpop.f32.mrb[31].mxu0  ;;  %1201 = vmatmul.mubr.msk.bf16.vlgmr.msra.gmra.mrb[28].mxu1 %vm89_vm2, %v905_v36 }
 0x342   :  { %v405_v40 = vpop.f32.mrb[8].mxu1 }
 0x343   :  { %v411_v41 = vadd.f32 %v405_v40, %v1501_v59  ;;  %v1122_v42 = vpop.f32.mrb[9].mxu1 }
 0x344   :  { %v408_v43 = vpop.f32.mrb[10].mxu1 }
 0x345   :  { %v1123_v44 = vpop.f32.mrb[11].mxu1 }
 0x34a   :  { %v515_v45 = vpop.f32.mrb[12].mxu1 }
 0x34b   :  { %v521_v46 = vadd.f32 %v515_v45, %v411_v41  ;;  %v1138_v47 = vpop.f32.mrb[13].mxu1 }
 0x34c   :  { %v518_v48 = vpop.f32.mrb[14].mxu1 }
 0x34d   :  { %v1139_v49 = vpop.f32.mrb[15].mxu1 }
 0x352   :  { %v625_v1 = vpop.f32.mrb[16].mxu1 }
 0x353   :  { %v631_v50 = vadd.f32 %v625_v1, %v521_v46  ;;  %v1154_v51 = vpop.f32.mrb[17].mxu1 }
 0x354   :  { %v628_v52 = vpop.f32.mrb[18].mxu1 }
 0x355   :  { %v1155_v53 = vpop.f32.mrb[19].mxu1 }
 0x35a   :  { %v735_v54 = vpop.f32.mrb[20].mxu1 }
 0x35b   :  { %v741_v55 = vadd.f32 %v735_v54, %v631_v50  ;;  %v1170_v56 = vpop.f32.mrb[21].mxu1 }
 0x35c   :  { %v738_v57 = vpop.f32.mrb[22].mxu1 }
 0x35d   :  { %v1171_v58 = vpop.f32.mrb[23].mxu1 }
 0x362   :  { %v845_v60 = vpop.f32.mrb[24].mxu1 }
 0x363   :  { %v851_v59 = vadd.f32 %v845_v60, %v741_v55  ;;  %v1186_v61 = vpop.f32.mrb[25].mxu1 }
 0x364   :  { %v848_v62 = vpop.f32.mrb[26].mxu1 }
 0x365   :  { %v1187_v63 = vpop.f32.mrb[27].mxu1 }
 0x36a   :  { %v955_v0 = vpop.f32.mrb[28].mxu1 }
 0x36b   :  { %v961_v3 = vadd.f32 %v955_v0, %v851_v59  ;;  %v1202_v4 = vpop.f32.mrb[29].mxu1 }
 0x36c   :  { %v958_v5 = vpop.f32.mrb[30].mxu1 }
 0x36d   :  { %v969_v6 = vadd.f32 %v1026_v2, %v961_v3  ;;  %v1203_v7 = vpop.f32.mrb[31].mxu1 }
 0x36f   :  { %v970_v9 = vmax.f32 %v969_v6, 0.0 }
 0x371   :  { %v978_v10 = vmul.f32 %v1027_v8, %v970_v9 }
 0x373   :  { %979 = vadd.xlane.f32.xlu0 %v978_v10 }
 0x400   :  { %v980_v12 = vpop.xlane.xlu0 %979 }
 0x401   :  { %v983_v13 = vadd.f32 %v982_v11, %v980_v12 }
 0x403   :  { %985 = vst.msk [vmem:[%s1547_s6] sm:$0xff] %vm984_vm10, %v983_v13 }
 0x404   :  { %990 = vsyncpa [#allocation4], 1 }
 0x405   :  { %991 = vsyncpa [#allocation6], 1 }

</bundles_post_ra>
